<compile_context>
chip_gen: v7x
topology: tpu7x:2x2x1
jax: 0.10.0
libtpu: 0.0.40
codegen_flags: <defaults>
</compile_context>

<pallas_src>
import functools

import jax
import jax.numpy as jnp
from jax import lax
from jax.experimental import pallas as pl
from jax.experimental.pallas import tpu as pltpu

EPS = 1e-5  # nn.LayerNorm default eps


def _round_up(n, m):
    return ((n + m - 1) // m) * m


def _layernorm(x, gamma, beta):
    # Single-pass mean/variance (var = E[x^2] - E[x]^2) -> one fewer serial
    # cross-lane reduction on the critical path.
    n = x.shape[-1]
    inv_n = 1.0 / n
    s1 = jnp.sum(x, axis=-1, keepdims=True)
    s2 = jnp.sum(x * x, axis=-1, keepdims=True)
    mu = s1 * inv_n
    var = s2 * inv_n - mu * mu
    return (x - mu) * lax.rsqrt(var + EPS) * gamma + beta


def actor_critic_kernel(
    state_ref,                 # [TB, S]  bf16
    w1_ref, w2_ref,            # features weights (bf16)
    wh1_ref, wh2_ref,          # fused actor+critic head weights (bf16, wh2 padded to 128 lanes)
    vec_ref,                   # [8, VW] f32: b1,g1,be1,b2,g2,be2,bh1,bh2 rows
    out_ref,                   # [TB, OW] f32: probs || value || zeros
    *,
    a_dim,
):
    h = w1_ref.shape[1]
    h2 = w2_ref.shape[1]
    h4x2 = wh1_ref.shape[1]
    out_w = wh2_ref.shape[1]

    x = state_ref[...]                          # bf16
    vec = vec_ref[...]                          # f32 [8, VW]
    b1, g1, be1 = vec[0:1, :h], vec[1:2, :h], vec[2:3, :h]
    b2, g2, be2 = vec[3:4, :h2], vec[4:5, :h2], vec[5:6, :h2]
    bh1 = vec[6:7, :h4x2]
    bh2 = vec[7:8, :out_w]

    # ----- features -----
    t = jnp.dot(x, w1_ref[...], preferred_element_type=jnp.float32) + b1
    t = jnp.maximum(t, 0.0)
    t = _layernorm(t, g1, be1)
    # Dropout(0.1) -> identity at inference

    t = jnp.dot(t.astype(w2_ref.dtype), w2_ref[...],
                preferred_element_type=jnp.float32) + b2
    t = jnp.maximum(t, 0.0)
    feat = _layernorm(t, g2, be2)
    # Dropout(0.1) -> identity at inference

    # ----- fused actor/critic heads -----
    y = jnp.dot(feat.astype(wh1_ref.dtype), wh1_ref[...],
                preferred_element_type=jnp.float32) + bh1
    y = jnp.maximum(y, 0.0)
    # Dropout(0.1) -> identity at inference

    # Block-diagonal, 128-lane-padded second layer:
    #   lv[:, :A] = logits, lv[:, A] = value, lv[:, A+1:] = exact zeros.
    lv = jnp.dot(y.astype(wh2_ref.dtype), wh2_ref[...],
                 preferred_element_type=jnp.float32) + bh2

    # Masked softmax over the full lane-dense slab, exact division so probs
    # sum to 1 to f32 precision.
    lane = lax.broadcasted_iota(jnp.int32, lv.shape, 1)
    is_logit = lane < a_dim
    logits = jnp.where(is_logit, lv, -jnp.inf)
    m = jnp.max(logits, axis=-1, keepdims=True)
    e = jnp.exp(logits - m)                     # exactly 0 in masked lanes
    probs = e / jnp.sum(e, axis=-1, keepdims=True)

    # Single full-width (unmasked) store: probs in logit lanes, lv elsewhere
    # (lane A carries the value, remaining lanes are exact zeros).
    out_ref[...] = jnp.where(is_logit, probs, lv)


def actor_critic_forward(state, params, tile_b=4096, stream_dtype=jnp.bfloat16):
    """state: [B, state_dim] f32.  Returns (probs [B, action_dim], value [B, 1])."""
    B, state_dim = state.shape
    action_dim = params["wa2"].shape[1]
    h = params["w1"].shape[1]
    h2 = params["w2"].shape[1]
    h4 = params["wa1"].shape[1]
    out_w = max(128, _round_up(action_dim + 1, 128))   # lane-dense output width

    # ---- fuse head weights (once per call, in the JAX wrapper) ----
    wh1 = jnp.concatenate([params["wa1"], params["wc1"]], axis=1)     # [h2, 2*h4]
    bh1 = jnp.concatenate([params["ba1"], params["bc1"]], axis=1)     # [1, 2*h4]
    wh2 = jnp.zeros((2 * h4, out_w), jnp.float32)
    wh2 = wh2.at[:h4, :action_dim].set(params["wa2"])                 # logits block
    wh2 = wh2.at[h4:, action_dim:action_dim + 1].set(params["wc2"])   # value block
    bh2 = jnp.zeros((1, out_w), jnp.float32)
    bh2 = bh2.at[:, :action_dim].set(params["ba2"])
    bh2 = bh2.at[:, action_dim:action_dim + 1].set(params["bc2"])

    # ---- pack the 8 per-feature vectors into one VMEM-resident slab ----
    vw = max(out_w, _round_up(h, 128))
    pad_row = lambda v: jnp.pad(v, ((0, 0), (0, vw - v.shape[1])))
    vec = jnp.concatenate(
        [pad_row(params["b1"]), pad_row(params["g1"]), pad_row(params["be1"]),
         pad_row(params["b2"]), pad_row(params["g2"]), pad_row(params["be2"]),
         pad_row(bh1), pad_row(bh2)],
        axis=0)                                                       # [8, vw] f32

    # ---- bf16 streaming of state + weights (f32 accumulation in-kernel) ----
    sd = state.astype(stream_dtype)
    w1 = params["w1"].astype(stream_dtype)
    w2 = params["w2"].astype(stream_dtype)
    wh1 = wh1.astype(stream_dtype)
    wh2 = wh2.astype(stream_dtype)

    # ---- batch tiling: big tiles, but >=2 grid steps for large B so both
    # v7x TensorCores get work; VMEM is not the binding constraint here. ----
    tb = min(tile_b, max(8, _round_up(pl.cdiv(B, 2), 8)))
    bp = _round_up(B, tb)
    if bp != B:
        sd = jnp.pad(sd, ((0, bp - B), (0, 0)))
    grid = (bp // tb,)

    args = (sd, w1, w2, wh1, wh2, vec)
    state_spec = pl.BlockSpec((tb, state_dim), lambda i: (i, 0))
    resident_specs = [pl.BlockSpec(a.shape, lambda i: (0, 0)) for a in args[1:]]
    in_specs = [state_spec] + resident_specs
    out_specs = pl.BlockSpec((tb, out_w), lambda i: (i, 0))
    out_shape = jax.ShapeDtypeStruct((bp, out_w), jnp.float32)

    kernel = functools.partial(actor_critic_kernel, a_dim=action_dim)
    out = pl.pallas_call(
        kernel,
        grid=grid,
        in_specs=in_specs,
        out_specs=out_specs,
        out_shape=out_shape,
        compiler_params=pltpu.CompilerParams(
            dimension_semantics=("parallel",),     # shard batch tiles across TCs (v7x)
            vmem_limit_bytes=32 * 1024 * 1024,     # safe on v5e's 16 MiB default scoped VMEM
        ),
    )(*args)

    probs = out[:B, :action_dim]
    value = out[:B, action_dim:action_dim + 1]
    return probs, value


def init_params(key, state_dim, action_dim, hidden_dim):
    """Deterministic synthetic parameters (shapes match nn.Module __init__)."""
    h, h2, h4 = hidden_dim, hidden_dim // 2, hidden_dim // 4
    keys = jax.random.split(key, 8)

    def lin(k, fan_in, fan_out):
        scale = 1.0 / jnp.sqrt(jnp.float32(fan_in))
        w = jax.random.uniform(k, (fan_in, fan_out), jnp.float32, -scale, scale)
        b = jnp.zeros((1, fan_out), jnp.float32)
        return w, b

    w1, b1 = lin(keys[0], state_dim, h)
    w2, b2 = lin(keys[1], h, h2)
    wa1, ba1 = lin(keys[2], h2, h4)
    wa2, ba2 = lin(keys[3], h4, action_dim)
    wc1, bc1 = lin(keys[4], h2, h4)
    wc2, bc2 = lin(keys[5], h4, 1)

    return {
        "w1": w1, "b1": b1,
        "g1": jnp.ones((1, h), jnp.float32), "be1": jnp.zeros((1, h), jnp.float32),
        "w2": w2, "b2": b2,
        "g2": jnp.ones((1, h2), jnp.float32), "be2": jnp.zeros((1, h2), jnp.float32),
        "wa1": wa1, "ba1": ba1, "wa2": wa2, "ba2": ba2,
        "wc1": wc1, "bc1": bc1, "wc2": wc2, "bc2": bc2,
    }


def reference_forward(state, p, matmul_dtype=jnp.float32):
    """Pure-JAX reference.  matmul_dtype=bf16 mirrors the kernel's precision
    (bf16 matmul inputs, f32 accumulation / LayerNorm / softmax)."""
    c = lambda a: a.astype(matmul_dtype)
    mm = lambda a, b: jnp.dot(c(a), c(b), preferred_element_type=jnp.float32)

    def ln(x, g, b):
        mu = jnp.mean(x, -1, keepdims=True)
        var = jnp.mean((x - mu) ** 2, -1, keepdims=True)
        return (x - mu) / jnp.sqrt(var + EPS) * g + b

    t = jnp.maximum(mm(state, p["w1"]) + p["b1"], 0.0)
    t = ln(t, p["g1"], p["be1"])
    t = jnp.maximum(mm(t, p["w2"]) + p["b2"], 0.0)
    feat = ln(t, p["g2"], p["be2"])
    a = jnp.maximum(mm(feat, p["wa1"]) + p["ba1"], 0.0)
    logits = mm(a, p["wa2"]) + p["ba2"]
    probs = jax.nn.softmax(logits, axis=-1)
    cr = jnp.maximum(mm(feat, p["wc1"]) + p["bc1"], 0.0)
    value = mm(cr, p["wc2"]) + p["bc2"]
    return probs, value


if __name__ == "__main__":
    B, STATE_DIM, ACTION_DIM, HIDDEN = 8, 16, 4, 32

    key = jax.random.PRNGKey(0)
    k_state, k_params = jax.random.split(key)
    state = jax.random.normal(k_state, (B, STATE_DIM), jnp.float32)
    params = init_params(k_params, STATE_DIM, ACTION_DIM, HIDDEN)

    probs, value = jax.block_until_ready(actor_critic_forward(state, params))
    assert probs.shape == (B, ACTION_DIM) and value.shape == (B, 1)

    # Tight check vs. a reference with the same bf16 matmul inputs / f32 accumulation.
    ref_probs, ref_value = reference_forward(state, params, matmul_dtype=jnp.bfloat16)
    assert jnp.allclose(probs, ref_probs, atol=5e-3, rtol=5e-3)
    assert jnp.allclose(value, ref_value, atol=5e-3, rtol=5e-3)

    # Exact-division softmax: rows sum to 1 to f32 precision.
    assert jnp.allclose(jnp.sum(probs, axis=-1), 1.0, atol=1e-4)

    # Loose sanity check vs. the pure-f32 reference (documents bf16 streaming fidelity).
    f32_probs, f32_value = reference_forward(state, params)
    assert jnp.allclose(probs, f32_probs, atol=5e-2)
    assert jnp.allclose(value, f32_value, atol=5e-2)

    print("KERNEL_OK")
</pallas_src>

<mosaic_0001>
module attributes {stable_mosaic.version = 11 : i64} {
  func.func @actor_critic_kernel(%arg0: i32, %arg1: memref<8x16xbf16, #tpu.memory_space<vmem>>, %arg2: memref<16x32xbf16, #tpu.memory_space<vmem>>, %arg3: memref<32x16xbf16, #tpu.memory_space<vmem>>, %arg4: memref<16x16xbf16, #tpu.memory_space<vmem>>, %arg5: memref<16x128xbf16, #tpu.memory_space<vmem>>, %arg6: memref<8x128xf32, #tpu.memory_space<vmem>>, %arg7: memref<8x128xf32, #tpu.memory_space<vmem>>) attributes {dimension_semantics = [#tpu.dimension_semantics<parallel>], iteration_bounds = array<i64: 1>, scalar_prefetch = 0 : i64, scratch_operands = 0 : i64, tpu.core_type = #tpu.core_type<tc>, window_params = [{transform_indices = @transform_0, window_bounds = array<i64: 8, 16>}, {pipeline_mode = #tpu.pipeline_mode<synchronous>, transform_indices = @transform_1, window_bounds = array<i64: 16, 32>}, {pipeline_mode = #tpu.pipeline_mode<synchronous>, transform_indices = @transform_2, window_bounds = array<i64: 32, 16>}, {pipeline_mode = #tpu.pipeline_mode<synchronous>, transform_indices = @transform_3, window_bounds = array<i64: 16, 16>}, {pipeline_mode = #tpu.pipeline_mode<synchronous>, transform_indices = @transform_4, window_bounds = array<i64: 16, 128>}, {pipeline_mode = #tpu.pipeline_mode<synchronous>, transform_indices = @transform_5, window_bounds = array<i64: 8, 128>}, {transform_indices = @transform_6, window_bounds = array<i64: 8, 128>}]} {
    %c0 = arith.constant 0 : index
    %c0_0 = arith.constant 0 : index
    %0 = vector.load %arg1[%c0, %c0_0] : memref<8x16xbf16, #tpu.memory_space<vmem>>, vector<8x16xbf16>
    %c0_1 = arith.constant 0 : index
    %c0_2 = arith.constant 0 : index
    %1 = vector.load %arg6[%c0_1, %c0_2] : memref<8x128xf32, #tpu.memory_space<vmem>>, vector<8x128xf32>
    %2 = vector.extract_strided_slice %1 {offsets = [0, 0], sizes = [1, 32], strides = [1, 1]} : vector<8x128xf32> to vector<1x32xf32>
    %3 = vector.extract_strided_slice %1 {offsets = [1, 0], sizes = [1, 32], strides = [1, 1]} : vector<8x128xf32> to vector<1x32xf32>
    %4 = vector.extract_strided_slice %1 {offsets = [2, 0], sizes = [1, 32], strides = [1, 1]} : vector<8x128xf32> to vector<1x32xf32>
    %5 = vector.extract_strided_slice %1 {offsets = [3, 0], sizes = [1, 16], strides = [1, 1]} : vector<8x128xf32> to vector<1x16xf32>
    %6 = vector.extract_strided_slice %1 {offsets = [4, 0], sizes = [1, 16], strides = [1, 1]} : vector<8x128xf32> to vector<1x16xf32>
    %7 = vector.extract_strided_slice %1 {offsets = [5, 0], sizes = [1, 16], strides = [1, 1]} : vector<8x128xf32> to vector<1x16xf32>
    %8 = vector.extract_strided_slice %1 {offsets = [6, 0], sizes = [1, 16], strides = [1, 1]} : vector<8x128xf32> to vector<1x16xf32>
    %9 = vector.extract_strided_slice %1 {offsets = [7, 0], sizes = [1, 128], strides = [1, 1]} : vector<8x128xf32> to vector<1x128xf32>
    %c0_3 = arith.constant 0 : index
    %c0_4 = arith.constant 0 : index
    %10 = vector.load %arg2[%c0_3, %c0_4] : memref<16x32xbf16, #tpu.memory_space<vmem>>, vector<16x32xbf16>
    %cst = arith.constant dense<0.000000e+00> : vector<8x32xf32>
    %11 = tpu.matmul %0, %10, %cst {dimension_numbers = #tpu.dot_dimension_numbers<[1], [0], [0], [1], [0, 0, 1, 1], [], []>} : vector<8x16xbf16>, vector<16x32xbf16>, vector<8x32xf32> -> vector<8x32xf32>
    %12 = vector.broadcast %2 : vector<1x32xf32> to vector<8x32xf32>
    %13 = arith.addf %11, %12 : vector<8x32xf32>
    %cst_5 = arith.constant 0.000000e+00 : f32
    %14 = vector.broadcast %cst_5 : f32 to vector<8x32xf32>
    %15 = arith.maximumf %13, %14 : vector<8x32xf32>
    %cst_6 = arith.constant dense<0.000000e+00> : vector<8xf32>
    %16 = vector.multi_reduction <add>, %15, %cst_6 [1] : vector<8x32xf32> to vector<8xf32>
    %17 = vector.shape_cast %16 : vector<8xf32> to vector<8x1xf32>
    %18 = arith.mulf %15, %15 : vector<8x32xf32>
    %cst_7 = arith.constant dense<0.000000e+00> : vector<8xf32>
    %19 = vector.multi_reduction <add>, %18, %cst_7 [1] : vector<8x32xf32> to vector<8xf32>
    %20 = vector.shape_cast %19 : vector<8xf32> to vector<8x1xf32>
    %cst_8 = arith.constant 3.125000e-02 : f32
    %21 = vector.broadcast %cst_8 : f32 to vector<8x1xf32>
    %22 = arith.mulf %17, %21 : vector<8x1xf32>
    %cst_9 = arith.constant 3.125000e-02 : f32
    %23 = vector.broadcast %cst_9 : f32 to vector<8x1xf32>
    %24 = arith.mulf %20, %23 : vector<8x1xf32>
    %25 = arith.mulf %22, %22 : vector<8x1xf32>
    %26 = arith.subf %24, %25 : vector<8x1xf32>
    %27 = vector.broadcast %22 : vector<8x1xf32> to vector<8x32xf32>
    %28 = arith.subf %15, %27 : vector<8x32xf32>
    %cst_10 = arith.constant 9.99999974E-6 : f32
    %29 = vector.broadcast %cst_10 : f32 to vector<8x1xf32>
    %30 = arith.addf %26, %29 : vector<8x1xf32>
    %31 = math.rsqrt %30 : vector<8x1xf32>
    %32 = vector.broadcast %31 : vector<8x1xf32> to vector<8x32xf32>
    %33 = arith.mulf %28, %32 : vector<8x32xf32>
    %34 = vector.broadcast %3 : vector<1x32xf32> to vector<8x32xf32>
    %35 = arith.mulf %33, %34 : vector<8x32xf32>
    %36 = vector.broadcast %4 : vector<1x32xf32> to vector<8x32xf32>
    %37 = arith.addf %35, %36 : vector<8x32xf32>
    %38 = arith.truncf %37 : vector<8x32xf32> to vector<8x32xbf16>
    %c0_11 = arith.constant 0 : index
    %c0_12 = arith.constant 0 : index
    %39 = vector.load %arg3[%c0_11, %c0_12] : memref<32x16xbf16, #tpu.memory_space<vmem>>, vector<32x16xbf16>
    %cst_13 = arith.constant dense<0.000000e+00> : vector<8x16xf32>
    %40 = tpu.matmul %38, %39, %cst_13 {dimension_numbers = #tpu.dot_dimension_numbers<[1], [0], [0], [1], [0, 0, 1, 1], [], []>} : vector<8x32xbf16>, vector<32x16xbf16>, vector<8x16xf32> -> vector<8x16xf32>
    %41 = vector.broadcast %5 : vector<1x16xf32> to vector<8x16xf32>
    %42 = arith.addf %40, %41 : vector<8x16xf32>
    %cst_14 = arith.constant 0.000000e+00 : f32
    %43 = vector.broadcast %cst_14 : f32 to vector<8x16xf32>
    %44 = arith.maximumf %42, %43 : vector<8x16xf32>
    %cst_15 = arith.constant dense<0.000000e+00> : vector<8xf32>
    %45 = vector.multi_reduction <add>, %44, %cst_15 [1] : vector<8x16xf32> to vector<8xf32>
    %46 = vector.shape_cast %45 : vector<8xf32> to vector<8x1xf32>
    %47 = arith.mulf %44, %44 : vector<8x16xf32>
    %cst_16 = arith.constant dense<0.000000e+00> : vector<8xf32>
    %48 = vector.multi_reduction <add>, %47, %cst_16 [1] : vector<8x16xf32> to vector<8xf32>
    %49 = vector.shape_cast %48 : vector<8xf32> to vector<8x1xf32>
    %cst_17 = arith.constant 6.250000e-02 : f32
    %50 = vector.broadcast %cst_17 : f32 to vector<8x1xf32>
    %51 = arith.mulf %46, %50 : vector<8x1xf32>
    %cst_18 = arith.constant 6.250000e-02 : f32
    %52 = vector.broadcast %cst_18 : f32 to vector<8x1xf32>
    %53 = arith.mulf %49, %52 : vector<8x1xf32>
    %54 = arith.mulf %51, %51 : vector<8x1xf32>
    %55 = arith.subf %53, %54 : vector<8x1xf32>
    %56 = vector.broadcast %51 : vector<8x1xf32> to vector<8x16xf32>
    %57 = arith.subf %44, %56 : vector<8x16xf32>
    %cst_19 = arith.constant 9.99999974E-6 : f32
    %58 = vector.broadcast %cst_19 : f32 to vector<8x1xf32>
    %59 = arith.addf %55, %58 : vector<8x1xf32>
    %60 = math.rsqrt %59 : vector<8x1xf32>
    %61 = vector.broadcast %60 : vector<8x1xf32> to vector<8x16xf32>
    %62 = arith.mulf %57, %61 : vector<8x16xf32>
    %63 = vector.broadcast %6 : vector<1x16xf32> to vector<8x16xf32>
    %64 = arith.mulf %62, %63 : vector<8x16xf32>
    %65 = vector.broadcast %7 : vector<1x16xf32> to vector<8x16xf32>
    %66 = arith.addf %64, %65 : vector<8x16xf32>
    %67 = arith.truncf %66 : vector<8x16xf32> to vector<8x16xbf16>
    %c0_20 = arith.constant 0 : index
    %c0_21 = arith.constant 0 : index
    %68 = vector.load %arg4[%c0_20, %c0_21] : memref<16x16xbf16, #tpu.memory_space<vmem>>, vector<16x16xbf16>
    %cst_22 = arith.constant dense<0.000000e+00> : vector<8x16xf32>
    %69 = tpu.matmul %67, %68, %cst_22 {dimension_numbers = #tpu.dot_dimension_numbers<[1], [0], [0], [1], [0, 0, 1, 1], [], []>} : vector<8x16xbf16>, vector<16x16xbf16>, vector<8x16xf32> -> vector<8x16xf32>
    %70 = vector.broadcast %8 : vector<1x16xf32> to vector<8x16xf32>
    %71 = arith.addf %69, %70 : vector<8x16xf32>
    %cst_23 = arith.constant 0.000000e+00 : f32
    %72 = vector.broadcast %cst_23 : f32 to vector<8x16xf32>
    %73 = arith.maximumf %71, %72 : vector<8x16xf32>
    %74 = arith.truncf %73 : vector<8x16xf32> to vector<8x16xbf16>
    %c0_24 = arith.constant 0 : index
    %c0_25 = arith.constant 0 : index
    %75 = vector.load %arg5[%c0_24, %c0_25] : memref<16x128xbf16, #tpu.memory_space<vmem>>, vector<16x128xbf16>
    %cst_26 = arith.constant dense<0.000000e+00> : vector<8x128xf32>
    %76 = tpu.matmul %74, %75, %cst_26 {dimension_numbers = #tpu.dot_dimension_numbers<[1], [0], [0], [1], [0, 0, 1, 1], [], []>} : vector<8x16xbf16>, vector<16x128xbf16>, vector<8x128xf32> -> vector<8x128xf32>
    %77 = vector.broadcast %9 : vector<1x128xf32> to vector<8x128xf32>
    %78 = arith.addf %76, %77 : vector<8x128xf32>
    %79 = tpu.iota {dimensions = array<i32: 1>} : vector<8x128xi32>
    %c4_i32 = arith.constant 4 : i32
    %80 = vector.broadcast %c4_i32 : i32 to vector<8x128xi32>
    %81 = arith.cmpi slt, %79, %80 : vector<8x128xi32>
    %cst_27 = arith.constant 0xFF800000 : f32
    %82 = vector.broadcast %cst_27 : f32 to vector<8x128xf32>
    %83 = arith.select %81, %78, %82 : vector<8x128xi1>, vector<8x128xf32>
    %cst_28 = arith.constant dense<0xFF800000> : vector<8xf32>
    %84 = vector.multi_reduction <maximumf>, %83, %cst_28 [1] : vector<8x128xf32> to vector<8xf32>
    %85 = vector.shape_cast %84 : vector<8xf32> to vector<8x1xf32>
    %86 = vector.broadcast %85 : vector<8x1xf32> to vector<8x128xf32>
    %87 = arith.subf %83, %86 : vector<8x128xf32>
    %88 = math.exp %87 : vector<8x128xf32>
    %cst_29 = arith.constant dense<0.000000e+00> : vector<8xf32>
    %89 = vector.multi_reduction <add>, %88, %cst_29 [1] : vector<8x128xf32> to vector<8xf32>
    %90 = vector.shape_cast %89 : vector<8xf32> to vector<8x1xf32>
    %91 = vector.broadcast %90 : vector<8x1xf32> to vector<8x128xf32>
    %92 = arith.divf %88, %91 : vector<8x128xf32>
    %93 = arith.select %81, %92, %78 : vector<8x128xi1>, vector<8x128xf32>
    %c0_30 = arith.constant 0 : index
    %c0_31 = arith.constant 0 : index
    %94 = vector.load %arg7[%c0_30, %c0_31] : memref<8x128xf32, #tpu.memory_space<vmem>>, vector<8x128xf32>
    tpu.vector_store %arg7[%c0_30, %c0_31], %93 {strides = array<i32>} : memref<8x128xf32, #tpu.memory_space<vmem>>, vector<8x128xf32>,
    return
  }
  func.func @transform_0(%arg0: i32) -> (i32, i32) {
    %c0_i32 = arith.constant 0 : i32
    %c0_i32_0 = arith.constant 0 : i32
    return %arg0, %c0_i32 : i32, i32
  }
  func.func @transform_1(%arg0: i32) -> (i32, i32) {
    %c0_i32 = arith.constant 0 : i32
    %c0_i32_0 = arith.constant 0 : i32
    %c0_i32_1 = arith.constant 0 : i32
    return %c0_i32, %c0_i32_0 : i32, i32
  }
  func.func @transform_2(%arg0: i32) -> (i32, i32) {
    %c0_i32 = arith.constant 0 : i32
    %c0_i32_0 = arith.constant 0 : i32
    %c0_i32_1 = arith.constant 0 : i32
    return %c0_i32, %c0_i32_0 : i32, i32
  }
  func.func @transform_3(%arg0: i32) -> (i32, i32) {
    %c0_i32 = arith.constant 0 : i32
    %c0_i32_0 = arith.constant 0 : i32
    %c0_i32_1 = arith.constant 0 : i32
    return %c0_i32, %c0_i32_0 : i32, i32
  }
  func.func @transform_4(%arg0: i32) -> (i32, i32) {
    %c0_i32 = arith.constant 0 : i32
    %c0_i32_0 = arith.constant 0 : i32
    %c0_i32_1 = arith.constant 0 : i32
    return %c0_i32, %c0_i32_0 : i32, i32
  }
  func.func @transform_5(%arg0: i32) -> (i32, i32) {
    %c0_i32 = arith.constant 0 : i32
    %c0_i32_0 = arith.constant 0 : i32
    %c0_i32_1 = arith.constant 0 : i32
    return %c0_i32, %c0_i32_0 : i32, i32
  }
  func.func @transform_6(%arg0: i32) -> (i32, i32) {
    %c0_i32 = arith.constant 0 : i32
    %c0_i32_0 = arith.constant 0 : i32
    return %arg0, %c0_i32 : i32, i32
  }
}

</mosaic_0001>

<bundles_post_ra>
// kernel: tpu_custom_call.1
= control target key start
LH: loop header
LB: loop body
LE: loop exit
PB: predicated region body
PF: predicated region fallthrough
CT: control target
= control target key end

     0   :  { %11 = vsyncpa [#allocation3], 0  ;;  %s581_s0 = inlined_call_operand.hbm [shape: bf16[8,16], index: 0, kind: input, shape index: {}]   ;;  %s582_s1 = inlined_call_operand.vmem [shape: bf16[16,32], index: 1, kind: input, shape index: {}]   ;;  %s583_s2 = inlined_call_operand.vmem [shape: bf16[32,16], index: 2, kind: input, shape index: {}]   ;;  %s584_s3 = inlined_call_operand.vmem [shape: bf16[16,16], index: 3, kind: input, shape index: {}]   ;;  %s585_s4 = inlined_call_operand.vmem [shape: bf16[16,128], index: 4, kind: input, shape index: {}]   ;;  %s586_s5 = inlined_call_operand.vmem [shape: f32[8,128], index: 5, kind: input, shape index: {}]   ;;  %s587_s6 = inlined_call_operand.hbm [shape: f32[8,128], index: 6, kind: output, shape index: {}]  }
   0x1   :  { %12 = vsyncpa [#allocation4], 0  ;;  %s464_s21 = smov [#allocation2]   ;;  %s416_s25 = scalar_lea.hbm %s581_s0, 64 }
   0x2   :  { %s19_s22 = sshll.u32 %s464_s21, 4  ;;  %p417_p0 = scmp.ne.s32.totalorder %s581_s0, %s416_s25  ;;  %s20_s22 = int_to_ptr.vmem [resolvable:$true] %s19_s22 }
   0x3   :  { %p420_p1 = scmp.lt.u32.totalorder %s416_s25, %s581_s0 }
   0x5   :  { %p422_p2 = pnand %p420_p1, %p417_p0 }
   0x7   :  { %425 = shalt.err (!%p422_p2)
}
   0x8   :  { %s426_s30 = scalar_lea.vmem %s20_s22, 64  ;;  %p431_p4 = scmp.lt.s32.totalorder %s20_s22, %s20_s22 }
   0x9   :  { %p427_p3 = scmp.ne.s32.totalorder %s20_s22, %s426_s30  ;;  %p432_p5 = scmp.lt.s32.totalorder %s426_s30, %s426_s30 }
   0xb   :  { %p433_p6 = por %p432_p5, %p431_p4 }
   0xd   :  { %p434_p7 = pnand %p433_p6, %p427_p3 }
   0xf   :  { %437 = shalt.err (!%p434_p7)
}
  0x10   :  { %22 = dma.hbm_to_vmem [thread:$0]  %s581_s0, 64, %s20_s22, [#allocation3]  }
  0x11   :  { %460 = dma.done.wait [#allocation3], 64  }
  0x12   :  { %461 = vsyncadd [#allocation3], 4294967232  ;;  %v465_v0 = vmov 0.0   ;;  %vm466_vm0 = vmmov 0   ;;  %v403_v1 = vld [vmem:[%s582_s1] sm:$0xff]   ;;  %vm51_vm1 = vcmask 130048   ;;  %v41_v3 = vlaneseq }
  0x13   :  { %373 = vmatprep.subr.bf16.mxu0 %v465_v0  ;;  %375 = vmatprep.mubr.msk.bf16.mxu0 %vm466_vm0, %v465_v0  ;;  %v37_v2 = vld [vmem:[#allocation2] sm:$0xf]  ;;  %vm96_vm2 = vcmask 261120   ;;  %v405_v18 = vld [vmem:[%s583_s2 + $0x8] sm:$0xff]  }
  0x14   :  { %379 = vmatprep.subr.bf16.mxu1 %v465_v0  ;;  %383 = vmatprep.mubr.msk.bf16.mxu1 %vm466_vm0, %v465_v0  ;;  %v523_v4 = vshrl.u32 %v41_v3, 7  ;;  %v529_v6 = vld [vmem:[%s586_s5] sm:$0xff] }
  0x15   :  { %374 = vmatpush3.bf16.msra.mxu0 %v403_v1  ;;  %v404_v17 = vld [vmem:[%s583_s2] sm:$0xff]  }
  0x16   :  { %387 = vmatprep.subr.bf16.mxu0 %v465_v0  ;;  %v43_v5 = vsub.s32 0, %v523_v4  ;;  %380 = vmatpush3.bf16.msra.mxu1 %v404_v17  ;;  %v114_v26 = vsub.s32 1, %v523_v4  ;;  %v119_v27 = vsub.s32 2, %v523_v4  ;;  %v129_v36 = vsub.s32 3, %v523_v4  ;;  %v406_v47 = vld [vmem:[%s584_s3] sm:$0xff]   ;;  %s467_s3 = smov [#allocation5]  }
  0x17   :  { %381 = vmatprep.subr.bf16.mxu1 %v465_v0  ;;  %v407_v48 = vld [vmem:[%s585_s4] sm:$0xff]   ;;  %v204_v56 = vsub.s32 4, %v523_v4  ;;  %v209_v57 = vsub.s32 5, %v523_v4  ;;  %s346_s4 = sshll.u32 %s467_s3, 4  ;;  %s347_s4 = int_to_ptr.vmem [resolvable:$true] %s346_s4 }
  0x18   :  { %376 = vmatmul.mubr.msk.bf16.vlgmr.msra.gmra.mrb[0].mxu0 %vm51_vm1, %v37_v2  ;;  %v44_v7 = vrot.slane %v529_v6, %v43_v5  ;;  %v115_v29 = vrot.slane %v529_v6, %v114_v26  ;;  %v120_v32 = vrot.slane %v529_v6, %v119_v27  ;;  %v130_v37 = vrot.slane %v529_v6, %v129_v36  ;;  %s438_s17 = scalar_lea.vmem %s347_s4, 128  ;;  %p443_p9 = scmp.lt.s32.totalorder %s347_s4, %s347_s4 }
  0x19   :  { %389 = vmatprep.mubr.msk.bf16.mxu0 %vm466_vm0, %v465_v0  ;;  %388 = vmatpush3.bf16.msra.mxu0 %v406_v47  ;;  %v205_v59 = vrot.slane %v529_v6, %v204_v56  ;;  %v210_v62 = vrot.slane %v529_v6, %v209_v57  ;;  %v217_v2 = vsub.s32 6, %v523_v4  ;;  %p439_p8 = scmp.ne.s32.totalorder %s347_s4, %s438_s17  ;;  %p444_p10 = scmp.lt.s32.totalorder %s438_s17, %s438_s17 }
  0x1a   :  { %382 = vmatpush3.bf16.msra.mxu1 %v405_v18 }
  0x1b   :  { %393 = vmatprep.subr.bf16.mxu1 %v465_v0  ;;  %v218_v5 = vrot.slane %v529_v6, %v217_v2  ;;  %p445_p11 = por %p444_p10, %p443_p9 }
  0x1d   :  { %p446_p12 = pnand %p445_p11, %p439_p8 }
  0xeb   :  { %v89_v8 = vpop.f32.mrb[0].mxu0 }
  0xec   :  { %v90_v9 = vadd.f32 %v89_v8, %v44_v7  ;;  %v377_v10 = vpop.f32.mrb[1].mxu0 }
  0xed   :  { %v92_v11 = vpop.f32.mrb[2].mxu0 }
  0xee   :  { %v95_v12 = vmax.f32 %v90_v9, 0.0  ;;  %v378_v13 = vpop.f32.mrb[3].mxu0 }
  0xf0   :  { %v97_v14 = vsel %vm96_vm2, %v95_v12, 0.0  ;;  %v100_v15 = vmul.f32 %v95_v12, %v95_v12 }
  0xf1   :  { %98 = vadd.xlane.f32.xlu0 %v97_v14  ;;  %v274_v14 = vsub.s32 7, %v523_v4 }
  0xf2   :  { %v101_v16 = vsel %vm96_vm2, %v100_v15, 0.0  ;;  %v326_v15 = vand.u32 127, %v41_v3 }
  0xf4   :  { %vm327_vm3 = vcmp.lt.s32.totalorder %v326_v15, 4 }
  0xf5   :  { %102 = vadd.xlane.f32.xlu0 %v101_v16  ;;  %v275_v16 = vrot.slane %v529_v6, %v274_v14 }
 0x17e   :  { %v99_v19 = vpop.xlane.xlu0 %98 }
 0x17f   :  { %v104_v20 = vmul.f32 0.03125, %v99_v19 }
 0x181   :  { %v106_v22 = vmul.f32 %v104_v20, %v104_v20  ;;  %v108_v28 = vsub.f32 %v95_v12, %v104_v20 }
 0x182   :  { %v103_v21 = vpop.xlane.xlu0 %102 }
 0x183   :  { %v105_v23 = vmul.f32 0.03125, %v103_v21 }
 0x185   :  { %v107_v24 = vsub.f32 %v105_v23, %v106_v22 }
 0x187   :  { %v109_v25 = vadd.f32 1e-05, %v107_v24 }
 0x189   :  { %408 = vrsqrt.f32 %v109_v25 }
 0x193   :  { %v409_v30 = vpop.eup %408 }
 0x194   :  { %v111_v31 = vmul.f32 %v409_v30, %v108_v28 }
 0x196   :  { %v116_v33 = vmul.f32 %v115_v29, %v111_v31 }
 0x198   :  { %v121_v34 = vadd.f32 %v120_v32, %v116_v33 }
 0x19a   :  { %v122_v35 = vpack.c.bf16 %v121_v34, %v121_v34 }
 0x19c   :  { %384 = vmatmul.mubr.msk.bf16.vlgmr.msra.gmra.mrb[0].mxu1 %vm96_vm2, %v122_v35 }
 0x19d   :  { %395 = vmatprep.mubr.msk.bf16.mxu1 %vm466_vm0, %v465_v0  ;;  %394 = vmatpush3.bf16.msra.mxu1 %v407_v48 }
 0x26f   :  { %v180_v38 = vpop.f32.mrb[0].mxu1 }
 0x270   :  { %v181_v39 = vadd.f32 %v180_v38, %v130_v37  ;;  %v385_v40 = vpop.f32.mrb[1].mxu1 }
 0x271   :  { %v183_v41 = vpop.f32.mrb[2].mxu1 }
 0x272   :  { %v186_v42 = vmax.f32 %v181_v39, 0.0  ;;  %v386_v43 = vpop.f32.mrb[3].mxu1 }
 0x274   :  { %v187_v44 = vsel %vm51_vm1, %v186_v42, 0.0  ;;  %v190_v45 = vmul.f32 %v186_v42, %v186_v42 }
 0x275   :  { %188 = vadd.xlane.f32.xlu1 %v187_v44 }
 0x276   :  { %v191_v46 = vsel %vm51_vm1, %v190_v45, 0.0 }
 0x279   :  { %192 = vadd.xlane.f32.xlu1 %v191_v46 }
 0x302   :  { %v189_v49 = vpop.xlane.xlu1 %188 }
 0x303   :  { %v194_v50 = vmul.f32 0.0625, %v189_v49 }
 0x305   :  { %v196_v52 = vmul.f32 %v194_v50, %v194_v50  ;;  %v198_v58 = vsub.f32 %v186_v42, %v194_v50 }
 0x306   :  { %v193_v51 = vpop.xlane.xlu1 %192 }
 0x307   :  { %v195_v53 = vmul.f32 0.0625, %v193_v51 }
 0x309   :  { %v197_v54 = vsub.f32 %v195_v53, %v196_v52 }
 0x30b   :  { %v199_v55 = vadd.f32 1e-05, %v197_v54 }
 0x30d   :  { %410 = vrsqrt.f32 %v199_v55 }
 0x317   :  { %v411_v60 = vpop.eup %410 }
 0x318   :  { %v201_v61 = vmul.f32 %v411_v60, %v198_v58 }
 0x31a   :  { %v206_v63 = vmul.f32 %v205_v59, %v201_v61 }
 0x31c   :  { %v211_v0 = vadd.f32 %v210_v62, %v206_v63 }
 0x31e   :  { %v212_v1 = vpack.c.bf16 %v211_v0, %v211_v0 }
 0x320   :  { %390 = vmatmul.mubr.msk.bf16.vlgmr.msra.gmra.mrb[4].mxu0 %vm51_vm1, %v212_v1 }
 0x3f3   :  { %v262_v7 = vpop.f32.mrb[4].mxu0 }
 0x3f4   :  { %v263_v8 = vadd.f32 %v262_v7, %v218_v5  ;;  %v391_v9 = vpop.f32.mrb[5].mxu0 }
 0x3f5   :  { %v265_v10 = vpop.f32.mrb[6].mxu0 }
 0x3f6   :  { %v268_v11 = vmax.f32 %v263_v8, 0.0  ;;  %v392_v12 = vpop.f32.mrb[7].mxu0 }
 0x3f8   :  { %v269_v13 = vpack.c.bf16 %v268_v11, %v268_v11 }
 0x3fa   :  { %396 = vmatmul.mubr.msk.bf16.vlgmr.msra.gmra.mrb[4].mxu1 %vm51_vm1, %v269_v13 }
 0x4cd   :  { %v319_v17 = vpop.f32.mrb[4].mxu1 }
 0x4ce   :  { %v320_v18 = vadd.f32 %v319_v17, %v275_v16  ;;  %v397_v19 = vpop.f32.mrb[5].mxu1 }
 0x4cf   :  { %v322_v20 = vpop.f32.mrb[6].mxu1 }
 0x4d0   :  { %v398_v21 = vpop.f32.mrb[7].mxu1  ;;  %v328_v22 = vsel %vm327_vm3, %v320_v18, -inf }
 0x4d1   :  { %329 = vmax.xlane.f32.xlu0 %v328_v22 }
 0x55e   :  { %v330_v23 = vpop.xlane.xlu0 %329 }
 0x55f   :  { %v331_v24 = vsub.f32 %v328_v22, %v330_v23 }
 0x561   :  { %v332_v25 = vmul.f32 1.442695, %v331_v24 }
 0x563   :  { %412 = vpow2.f32 %v332_v25 }
 0x56d   :  { %v413_v26 = vpop.eup %412 }
 0x56e   :  { %334 = vadd.xlane.f32.xlu1 %v413_v26 }
 0x5fb   :  { %v335_v4 = vpop.xlane.xlu1 %334 }
 0x5fc   :  { %414 = vrcp.f32 %v335_v4 }
 0x606   :  { %v415_v3 = vpop.eup %414 }
 0x607   :  { %v337_v6 = vmul.f32 %v415_v3, %v413_v26 }
 0x609   :  { %v338_v27 = vsel %vm327_vm3, %v337_v6, %v320_v18 }
 0x60a   :  { %339 = vst [vmem:[#allocation5] sm:$0xff] %v338_v27 }
 0x60b   :  { %449 = shalt.err (!%p446_p12)
}
 0x60c   :  { %s450_s20 = scalar_lea.hbm %s587_s6, 128 }
 0x60d   :  { %p451_p13 = scmp.ne.s32.totalorder %s587_s6, %s450_s20  ;;  %p454_p0 = scmp.lt.u32.totalorder %s450_s20, %s587_s6 }
 0x60f   :  { %p456_p1 = pnand %p454_p0, %p451_p13 }
 0x611   :  { %459 = shalt.err (!%p456_p1)
}
 0x612   :  { %349 = dma.vmem_to_hbm [thread:$0]  %s347_s4, 128, %s587_s6, [#allocation4]  }
 0x613   :  { %462 = dma.done.wait [#allocation4], 128  }
 0x614   :  { %463 = vsyncadd [#allocation4], 4294967168 }
 0x615   :  { %353 = vsyncpa [#allocation3], 1 }
 0x616   :  { %354 = vsyncpa [#allocation4], 1 }

</bundles_post_ra>
